<compile_context>
chip_gen: v7x
topology: tpu7x:2x2x1
jax: 0.10.0
libtpu: 0.0.40
codegen_flags: <defaults>
</compile_context>

<pallas_src>
import jax
import jax.numpy as jnp
from jax.experimental import pallas as pl
from jax.experimental.pallas import tpu as pltpu


# --------------------------------------------------------------------------- helpers

def _round_up(x, m):
    return ((x + m - 1) // m) * m


def _pick_tile(batch):
    """Batch-tile size + VMEM budget.

    Live bytes per batch element of tile are ~0.7 KiB (double-buffered x/o blocks + f32
    intermediates), so:
      * 16K tile ~= 11.5 MiB -> safe on every generation once the scoped limit is raised to
        32 MiB (v5e's default is only 16 MiB, v7x physical VMEM is 64 MiB).
      * 32K tile ~= 23 MiB   -> only when the chip reports >= 96 MiB physical VMEM (v5e/v6e).
    The tile is also clamped so the batch grid keeps >= 4 steps so v7x's two TensorCores both
    get work via dimension_semantics=("parallel",).
    """
    tb_max = 16 * 1024
    vmem_limit = 32 * 1024 * 1024
    try:
        cap = int(getattr(pltpu.get_tpu_info(), "vmem_capacity_bytes", 0) or 0)
        if cap >= 96 * 1024 * 1024:          # v5e / v6e (128 MiB physical VMEM)
            tb_max = 32 * 1024
            vmem_limit = 64 * 1024 * 1024
    except Exception:
        pass                                  # conservative defaults are safe everywhere
    # Multiple of 512 keeps tb//4 lane-aligned (128) for the interleaved output blocks.
    tb = min(tb_max, max(512, _round_up(pl.cdiv(batch, 4), 512)))
    return tb, vmem_limit


def _cost_estimate(bp, num_actions, action_dim):
    flops = 2 * bp * action_dim * (num_actions + action_dim) + 4 * bp * action_dim
    bytes_accessed = 4 * (num_actions * bp + action_dim * bp
                          + num_actions * action_dim + action_dim * action_dim
                          + 2 * action_dim)
    return pl.CostEstimate(flops=int(flops),
                           transcendentals=int(bp * action_dim),
                           bytes_accessed=int(bytes_accessed))


# --------------------------------------------------------------------------- kernels

def _mlp_body(xT_ref, w1t_ref, b1_ref, w2t_ref, b2_ref, *, broadcast_load):
    """Shared dense (lane = batch) compute: z = W2^T @ silu(W1^T x^T + b1) + b2, (D, tb) f32."""
    num_actions = xT_ref.shape[0]
    action_dim = w1t_ref.shape[0]

    # Layer 1: K = num_actions (4) -> unrolled rank-1 multiply-adds on the VPU.
    # Bias is the accumulator init; broadcasts to (D, tb) on the first madd.
    h = b1_ref[...].astype(jnp.float32)                          # (D, 1)
    if broadcast_load:
        for k in range(num_actions):                             # unrolled at trace time
            # Stride-0 sublane-broadcast load: row k replicated across D sublanes in the vld slot
            # instead of materializing a (D, tb) broadcast on the VPU/XLU.
            xk = xT_ref[pl.ds(k, action_dim, stride=0), :].astype(jnp.float32)   # (D, tb)
            h = h + w1t_ref[:, k:k + 1].astype(jnp.float32) * xk
    else:
        xT = xT_ref[...].astype(jnp.float32)                     # (A, tb)
        w1t = w1t_ref[...].astype(jnp.float32)                   # (D, A)
        for k in range(num_actions):
            h = h + w1t[:, k:k + 1] * xT[k:k + 1, :]

    # SiLU in f32 (EUP sigmoid + VPU multiply).
    h = h * jax.nn.sigmoid(h)

    # Layer 2 on the MXU, lane axis = batch tile.  Precision pinned: exact f32, no silent bf16.
    z = jnp.dot(w2t_ref[...].astype(jnp.float32), h,
                preferred_element_type=jnp.float32,
                precision=jax.lax.Precision.HIGHEST)
    return z + b2_ref[...].astype(jnp.float32)                   # (D, tb)


def _fused_kernel(xT_ref, w1t_ref, b1_ref, w2t_ref, b2_ref, o_ref):
    """Primary kernel: emits the row-major output directly as (tb//ilv, ilv*D) = (tb//4, 128)."""
    action_dim = w1t_ref.shape[0]
    ilv = o_ref.shape[1] // action_dim            # output rows interleaved per 128-lane row (4)
    tbi = o_ref.shape[0]                          # tb // ilv

    z = _mlp_body(xT_ref, w1t_ref, b1_ref, w2t_ref, b2_ref, broadcast_load=True)

    # In-kernel relayout (features: sublanes -> lanes).  The wrapper pre-permuted the batch so
    # lane group g of the output block corresponds to the g-th contiguous quarter of z; only
    # plain slices + small transposes are needed, hidden under the output DMA.
    for g in range(ilv):
        o_ref[:, g * action_dim:(g + 1) * action_dim] = (
            z[:, g * tbi:(g + 1) * tbi].T.astype(o_ref.dtype))


def _transposed_kernel(xT_ref, w1t_ref, b1_ref, w2t_ref, b2_ref, o_ref):
    """Fallback kernel (proven path): lane-dense (D, tb) output blocks, transposed in XLA."""
    z = _mlp_body(xT_ref, w1t_ref, b1_ref, w2t_ref, b2_ref, broadcast_load=False)
    o_ref[...] = z.astype(o_ref.dtype)


# --------------------------------------------------------------------------- wrappers

def _action_mlp_fused(x, w1, b1, w2, b2):
    batch, num_actions = x.shape
    action_dim = w1.shape[1]
    ilv = 128 // action_dim                        # 4 for action_dim = 32
    tb, vmem_limit = _pick_tile(batch)
    bp = _round_up(batch, tb)
    ntiles = bp // tb
    tbi = tb // ilv

    x_pad = x if bp == batch else jnp.pad(x, ((0, bp - batch), (0, 0)))
    # One fused pad + permute + transpose copy of x in XLA: within each tile, batch row
    # i*tb + ilv*r + g is placed at lane position g*(tb//ilv) + r, so the kernel epilogue only
    # needs contiguous slices to rebuild row-major output order.
    xT = (x_pad.reshape(ntiles, tbi, ilv, num_actions)
               .transpose(0, 2, 1, 3)
               .reshape(bp, num_actions).T)                       # (A, Bp)

    w1t = w1.T                                     # (D, A)
    w2t = w2.T                                     # (D, D)
    b1c = b1.reshape(action_dim, 1)
    b2c = b2.reshape(action_dim, 1)

    out = pl.pallas_call(
        _fused_kernel,
        out_shape=jax.ShapeDtypeStruct((bp // ilv, ilv * action_dim), jnp.float32),
        grid=(ntiles,),
        in_specs=[
            # Streamed batch tile (double-buffered by the Pallas pipeline).
            pl.BlockSpec((num_actions, tb), lambda i: (0, i)),
            # Weights / biases: constant index_map -> fetched once, resident in VMEM.
            pl.BlockSpec((action_dim, num_actions), lambda i: (0, 0)),
            pl.BlockSpec((action_dim, 1), lambda i: (0, 0)),
            pl.BlockSpec((action_dim, action_dim), lambda i: (0, 0)),
            pl.BlockSpec((action_dim, 1), lambda i: (0, 0)),
        ],
        out_specs=pl.BlockSpec((tbi, ilv * action_dim), lambda i: (i, 0)),
        compiler_params=pltpu.CompilerParams(
            dimension_semantics=("parallel",),
            vmem_limit_bytes=vmem_limit),
        cost_estimate=_cost_estimate(bp, num_actions, action_dim),
    )(xT, w1t, b1c, w2t, b2c)

    out = out.reshape(bp, action_dim)              # free reshape: already row-major
    return out if bp == batch else out[:batch]


def _action_mlp_transposed(x, w1, b1, w2, b2):
    batch, num_actions = x.shape
    action_dim = w1.shape[1]
    tb, vmem_limit = _pick_tile(batch)
    bp = _round_up(batch, tb)
    ntiles = bp // tb

    xT = jnp.pad(x, ((0, bp - batch), (0, 0))).T                  # (A, Bp)
    w1t = w1.T
    w2t = w2.T
    b1c = b1.reshape(action_dim, 1)
    b2c = b2.reshape(action_dim, 1)

    oT = pl.pallas_call(
        _transposed_kernel,
        out_shape=jax.ShapeDtypeStruct((action_dim, bp), jnp.float32),
        grid=(ntiles,),
        in_specs=[
            pl.BlockSpec((num_actions, tb), lambda i: (0, i)),
            pl.BlockSpec((action_dim, num_actions), lambda i: (0, 0)),
            pl.BlockSpec((action_dim, 1), lambda i: (0, 0)),
            pl.BlockSpec((action_dim, action_dim), lambda i: (0, 0)),
            pl.BlockSpec((action_dim, 1), lambda i: (0, 0)),
        ],
        out_specs=pl.BlockSpec((action_dim, tb), lambda i: (0, i)),
        compiler_params=pltpu.CompilerParams(
            dimension_semantics=("parallel",),
            vmem_limit_bytes=vmem_limit),
        cost_estimate=_cost_estimate(bp, num_actions, action_dim),
    )(xT, w1t, b1c, w2t, b2c)

    # TODO(synk): this path keeps one XLA transpose of the output (~2x extra HBM traffic); it is
    # only taken when the fused row-major-output kernel cannot be lowered on this Mosaic build.
    return oT.T[:batch, :]


# --------------------------------------------------------------------------- reference / dispatch

def action_mlp_ref(x, w1, b1, w2, b2):
    h = jnp.dot(x, w1, precision=jax.lax.Precision.HIGHEST) + b1
    h = h * jax.nn.sigmoid(h)
    return jnp.dot(h, w2, precision=jax.lax.Precision.HIGHEST) + b2


def init_params(key, num_actions=4, action_dim=32):
    """Deterministic parameter init matching nn.Linear shapes.
    PyTorch weight shapes are (out, in); we store transposed (in, out)."""
    k1, k2, k3, k4 = jax.random.split(key, 4)
    bound1 = 1.0 / jnp.sqrt(num_actions)
    bound2 = 1.0 / jnp.sqrt(action_dim)
    w1 = jax.random.uniform(k1, (num_actions, action_dim), jnp.float32, -bound1, bound1)
    b1 = jax.random.uniform(k2, (action_dim,), jnp.float32, -bound1, bound1)
    w2 = jax.random.uniform(k3, (action_dim, action_dim), jnp.float32, -bound2, bound2)
    b2 = jax.random.uniform(k4, (action_dim,), jnp.float32, -bound2, bound2)
    return w1, b1, w2, b2


_FUSED_OK = {}   # (num_actions, action_dim) -> bool


def _fused_supported(num_actions, action_dim):
    """One-time feature detection (compile + tiny numerical check) of the fused-output kernel.
    Runs eagerly on first use; on any lowering failure or mismatch we permanently fall back."""
    key = (num_actions, action_dim)
    if key not in _FUSED_OK:
        ok = (128 % action_dim == 0) and (action_dim % 8 == 0)
        if ok:
            try:
                kx, kp = jax.random.split(jax.random.PRNGKey(42))
                xp = jax.random.normal(kx, (389, num_actions), jnp.float32)  # odd: exercises pad
                params = init_params(kp, num_actions, action_dim)
                got = jax.block_until_ready(_action_mlp_fused(xp, *params))
                want = action_mlp_ref(xp, *params)
                ok = bool(jnp.allclose(got, want, atol=1e-4, rtol=1e-4))
            except Exception:
                ok = False
        _FUSED_OK[key] = ok
    return _FUSED_OK[key]


def action_mlp(x, w1, b1, w2, b2):
    """x: (B, num_actions) f32; w1: (num_actions, action_dim); b1: (action_dim,);
    w2: (action_dim, action_dim); b2: (action_dim,)  ->  (B, action_dim) f32.
    Equivalent to PyTorch: Linear -> SiLU -> Linear with weights stored transposed (in, out)."""
    assert x.ndim == 2
    num_actions = x.shape[1]
    action_dim = w1.shape[1]
    if _fused_supported(num_actions, action_dim):
        return _action_mlp_fused(x, w1, b1, w2, b2)
    return _action_mlp_transposed(x, w1, b1, w2, b2)


# --------------------------------------------------------------------------- self-test

if __name__ == "__main__":
    num_actions, action_dim = 4, 32

    key = jax.random.PRNGKey(0)
    kx, kp, kx2 = jax.random.split(key, 3)
    w1, b1, w2, b2 = init_params(kp, num_actions, action_dim)

    # Small batch (single tile, grid=(1,)).
    batch = 8
    x = jax.random.normal(kx, (batch, num_actions), jnp.float32)
    out = jax.block_until_ready(action_mlp(x, w1, b1, w2, b2))
    ref = action_mlp_ref(x, w1, b1, w2, b2)
    assert out.shape == (batch, action_dim)
    assert jnp.allclose(out, ref, atol=1e-5, rtol=1e-5)

    # Larger, non-aligned batch exercises padding + the multi-step pipelined batch grid.
    batch2 = 1000
    x2 = jax.random.normal(kx2, (batch2, num_actions), jnp.float32)
    out2 = jax.block_until_ready(action_mlp(x2, w1, b1, w2, b2))
    ref2 = action_mlp_ref(x2, w1, b1, w2, b2)
    assert out2.shape == (batch2, action_dim)
    assert jnp.allclose(out2, ref2, atol=1e-5, rtol=1e-5)

    print("KERNEL_OK")
</pallas_src>

<mosaic_0001>
module attributes {stable_mosaic.version = 11 : i64} {
  func.func @_fused_kernel(%arg0: i32, %arg1: memref<4x512xf32, #tpu.memory_space<vmem>>, %arg2: memref<32x4xf32, #tpu.memory_space<vmem>>, %arg3: memref<32x1xf32, #tpu.memory_space<vmem>>, %arg4: memref<32x32xf32, #tpu.memory_space<vmem>>, %arg5: memref<32x1xf32, #tpu.memory_space<vmem>>, %arg6: memref<128x128xf32, #tpu.memory_space<vmem>>) attributes {dimension_semantics = [#tpu.dimension_semantics<parallel>], iteration_bounds = array<i64: 1>, scalar_prefetch = 0 : i64, scratch_operands = 0 : i64, tpu.core_type = #tpu.core_type<tc>, window_params = [{transform_indices = @transform_0, window_bounds = array<i64: 4, 512>}, {pipeline_mode = #tpu.pipeline_mode<synchronous>, transform_indices = @transform_1, window_bounds = array<i64: 32, 4>}, {pipeline_mode = #tpu.pipeline_mode<synchronous>, transform_indices = @transform_2, window_bounds = array<i64: 32, 1>}, {pipeline_mode = #tpu.pipeline_mode<synchronous>, transform_indices = @transform_3, window_bounds = array<i64: 32, 32>}, {pipeline_mode = #tpu.pipeline_mode<synchronous>, transform_indices = @transform_4, window_bounds = array<i64: 32, 1>}, {transform_indices = @transform_5, window_bounds = array<i64: 128, 128>}]} {
    %c0 = arith.constant 0 : index
    %c0_0 = arith.constant 0 : index
    %0 = vector.load %arg3[%c0, %c0_0] : memref<32x1xf32, #tpu.memory_space<vmem>>, vector<32x1xf32>
    %c0_1 = arith.constant 0 : index
    %c0_2 = arith.constant 0 : index
    %1 = tpu.strided_load %arg1[%c0_1, %c0_2] {strides = array<i32: 0, 1>} : memref<4x512xf32, #tpu.memory_space<vmem>>, vector<32x512xf32>
    %c0_3 = arith.constant 0 : index
    %c0_4 = arith.constant 0 : index
    %2 = vector.load %arg2[%c0_3, %c0_4] : memref<32x4xf32, #tpu.memory_space<vmem>>, vector<32x1xf32>
    %3 = vector.broadcast %2 : vector<32x1xf32> to vector<32x512xf32>
    %4 = arith.mulf %3, %1 : vector<32x512xf32>
    %5 = vector.broadcast %0 : vector<32x1xf32> to vector<32x512xf32>
    %6 = arith.addf %5, %4 : vector<32x512xf32>
    %c1 = arith.constant 1 : index
    %c0_5 = arith.constant 0 : index
    %7 = tpu.strided_load %arg1[%c1, %c0_5] {strides = array<i32: 0, 1>} : memref<4x512xf32, #tpu.memory_space<vmem>>, vector<32x512xf32>
    %c0_6 = arith.constant 0 : index
    %c1_7 = arith.constant 1 : index
    %8 = vector.load %arg2[%c0_6, %c1_7] : memref<32x4xf32, #tpu.memory_space<vmem>>, vector<32x1xf32>
    %9 = vector.broadcast %8 : vector<32x1xf32> to vector<32x512xf32>
    %10 = arith.mulf %9, %7 : vector<32x512xf32>
    %11 = arith.addf %6, %10 : vector<32x512xf32>
    %c2 = arith.constant 2 : index
    %c0_8 = arith.constant 0 : index
    %12 = tpu.strided_load %arg1[%c2, %c0_8] {strides = array<i32: 0, 1>} : memref<4x512xf32, #tpu.memory_space<vmem>>, vector<32x512xf32>
    %c0_9 = arith.constant 0 : index
    %c2_10 = arith.constant 2 : index
    %13 = vector.load %arg2[%c0_9, %c2_10] : memref<32x4xf32, #tpu.memory_space<vmem>>, vector<32x1xf32>
    %14 = vector.broadcast %13 : vector<32x1xf32> to vector<32x512xf32>
    %15 = arith.mulf %14, %12 : vector<32x512xf32>
    %16 = arith.addf %11, %15 : vector<32x512xf32>
    %c3 = arith.constant 3 : index
    %c0_11 = arith.constant 0 : index
    %17 = tpu.strided_load %arg1[%c3, %c0_11] {strides = array<i32: 0, 1>} : memref<4x512xf32, #tpu.memory_space<vmem>>, vector<32x512xf32>
    %c0_12 = arith.constant 0 : index
    %c3_13 = arith.constant 3 : index
    %18 = vector.load %arg2[%c0_12, %c3_13] : memref<32x4xf32, #tpu.memory_space<vmem>>, vector<32x1xf32>
    %19 = vector.broadcast %18 : vector<32x1xf32> to vector<32x512xf32>
    %20 = arith.mulf %19, %17 : vector<32x512xf32>
    %21 = arith.addf %16, %20 : vector<32x512xf32>
    %22 = arith.negf %21 : vector<32x512xf32>
    %23 = math.exp %22 : vector<32x512xf32>
    %cst = arith.constant 1.000000e+00 : f32
    %24 = vector.broadcast %cst : f32 to vector<32x512xf32>
    %25 = arith.addf %24, %23 : vector<32x512xf32>
    %26 = arith.divf %24, %25 : vector<32x512xf32>
    %27 = arith.mulf %21, %26 : vector<32x512xf32>
    %c0_14 = arith.constant 0 : index
    %c0_15 = arith.constant 0 : index
    %28 = vector.load %arg4[%c0_14, %c0_15] : memref<32x32xf32, #tpu.memory_space<vmem>>, vector<32x32xf32>
    %cst_16 = arith.constant dense<0.000000e+00> : vector<32x512xf32>
    %29 = tpu.matmul %28, %27, %cst_16 {dimension_numbers = #tpu.dot_dimension_numbers<[1], [0], [0], [1], [0, 0, 1, 1], [], []>, precision = #tpu.contract_precision<fp32>} : vector<32x32xf32>, vector<32x512xf32>, vector<32x512xf32> -> vector<32x512xf32>
    %c0_17 = arith.constant 0 : index
    %c0_18 = arith.constant 0 : index
    %30 = vector.load %arg5[%c0_17, %c0_18] : memref<32x1xf32, #tpu.memory_space<vmem>>, vector<32x1xf32>
    %31 = vector.broadcast %30 : vector<32x1xf32> to vector<32x512xf32>
    %32 = arith.addf %29, %31 : vector<32x512xf32>
    %33 = vector.extract_strided_slice %32 {offsets = [0, 0], sizes = [32, 128], strides = [1, 1]} : vector<32x512xf32> to vector<32x128xf32>
    %34 = tpu.transpose %33, [1, 0] : vector<32x128xf32> -> vector<128x32xf32>
    %c0_19 = arith.constant 0 : index
    %c0_20 = arith.constant 0 : index
    %35 = vector.load %arg6[%c0_19, %c0_20] : memref<128x128xf32, #tpu.memory_space<vmem>>, vector<128x32xf32>
    tpu.vector_store %arg6[%c0_19, %c0_20], %34 {strides = array<i32>} : memref<128x128xf32, #tpu.memory_space<vmem>>, vector<128x32xf32>,
    %36 = vector.extract_strided_slice %32 {offsets = [0, 128], sizes = [32, 128], strides = [1, 1]} : vector<32x512xf32> to vector<32x128xf32>
    %37 = tpu.transpose %36, [1, 0] : vector<32x128xf32> -> vector<128x32xf32>
    %c0_21 = arith.constant 0 : index
    %c32 = arith.constant 32 : index
    %38 = vector.load %arg6[%c0_21, %c32] : memref<128x128xf32, #tpu.memory_space<vmem>>, vector<128x32xf32>
    tpu.vector_store %arg6[%c0_21, %c32], %37 {strides = array<i32>} : memref<128x128xf32, #tpu.memory_space<vmem>>, vector<128x32xf32>,
    %39 = vector.extract_strided_slice %32 {offsets = [0, 256], sizes = [32, 128], strides = [1, 1]} : vector<32x512xf32> to vector<32x128xf32>
    %40 = tpu.transpose %39, [1, 0] : vector<32x128xf32> -> vector<128x32xf32>
    %c0_22 = arith.constant 0 : index
    %c64 = arith.constant 64 : index
    %41 = vector.load %arg6[%c0_22, %c64] : memref<128x128xf32, #tpu.memory_space<vmem>>, vector<128x32xf32>
    tpu.vector_store %arg6[%c0_22, %c64], %40 {strides = array<i32>} : memref<128x128xf32, #tpu.memory_space<vmem>>, vector<128x32xf32>,
    %42 = vector.extract_strided_slice %32 {offsets = [0, 384], sizes = [32, 128], strides = [1, 1]} : vector<32x512xf32> to vector<32x128xf32>
    %43 = tpu.transpose %42, [1, 0] : vector<32x128xf32> -> vector<128x32xf32>
    %c0_23 = arith.constant 0 : index
    %c96 = arith.constant 96 : index
    %44 = vector.load %arg6[%c0_23, %c96] : memref<128x128xf32, #tpu.memory_space<vmem>>, vector<128x32xf32>
    tpu.vector_store %arg6[%c0_23, %c96], %43 {strides = array<i32>} : memref<128x128xf32, #tpu.memory_space<vmem>>, vector<128x32xf32>,
    return
  }
  func.func @transform_0(%arg0: i32) -> (i32, i32) {
    %c0_i32 = arith.constant 0 : i32
    %c0_i32_0 = arith.constant 0 : i32
    return %c0_i32, %arg0 : i32, i32
  }
  func.func @transform_1(%arg0: i32) -> (i32, i32) {
    %c0_i32 = arith.constant 0 : i32
    %c0_i32_0 = arith.constant 0 : i32
    %c0_i32_1 = arith.constant 0 : i32
    return %c0_i32, %c0_i32_0 : i32, i32
  }
  func.func @transform_2(%arg0: i32) -> (i32, i32) {
    %c0_i32 = arith.constant 0 : i32
    %c0_i32_0 = arith.constant 0 : i32
    %c0_i32_1 = arith.constant 0 : i32
    return %c0_i32, %c0_i32_0 : i32, i32
  }
  func.func @transform_3(%arg0: i32) -> (i32, i32) {
    %c0_i32 = arith.constant 0 : i32
    %c0_i32_0 = arith.constant 0 : i32
    %c0_i32_1 = arith.constant 0 : i32
    return %c0_i32, %c0_i32_0 : i32, i32
  }
  func.func @transform_4(%arg0: i32) -> (i32, i32) {
    %c0_i32 = arith.constant 0 : i32
    %c0_i32_0 = arith.constant 0 : i32
    %c0_i32_1 = arith.constant 0 : i32
    return %c0_i32, %c0_i32_0 : i32, i32
  }
  func.func @transform_5(%arg0: i32) -> (i32, i32) {
    %c0_i32 = arith.constant 0 : i32
    %c0_i32_0 = arith.constant 0 : i32
    return %arg0, %c0_i32 : i32, i32
  }
}

module attributes {stable_mosaic.version = 11 : i64} {
  func.func @_transposed_kernel(%arg0: i32, %arg1: memref<4x512xf32, #tpu.memory_space<vmem>>, %arg2: memref<32x4xf32, #tpu.memory_space<vmem>>, %arg3: memref<32x1xf32, #tpu.memory_space<vmem>>, %arg4: memref<32x32xf32, #tpu.memory_space<vmem>>, %arg5: memref<32x1xf32, #tpu.memory_space<vmem>>, %arg6: memref<32x512xf32, #tpu.memory_space<vmem>>) attributes {dimension_semantics = [#tpu.dimension_semantics<parallel>], iteration_bounds = array<i64: 1>, scalar_prefetch = 0 : i64, scratch_operands = 0 : i64, tpu.core_type = #tpu.core_type<tc>, window_params = [{transform_indices = @transform_0, window_bounds = array<i64: 4, 512>}, {pipeline_mode = #tpu.pipeline_mode<synchronous>, transform_indices = @transform_1, window_bounds = array<i64: 32, 4>}, {pipeline_mode = #tpu.pipeline_mode<synchronous>, transform_indices = @transform_2, window_bounds = array<i64: 32, 1>}, {pipeline_mode = #tpu.pipeline_mode<synchronous>, transform_indices = @transform_3, window_bounds = array<i64: 32, 32>}, {pipeline_mode = #tpu.pipeline_mode<synchronous>, transform_indices = @transform_4, window_bounds = array<i64: 32, 1>}, {transform_indices = @transform_5, window_bounds = array<i64: 32, 512>}]} {
    %c0 = arith.constant 0 : index
    %c0_0 = arith.constant 0 : index
    %0 = vector.load %arg3[%c0, %c0_0] : memref<32x1xf32, #tpu.memory_space<vmem>>, vector<32x1xf32>
    %c0_1 = arith.constant 0 : index
    %c0_2 = arith.constant 0 : index
    %1 = vector.load %arg1[%c0_1, %c0_2] : memref<4x512xf32, #tpu.memory_space<vmem>>, vector<4x512xf32>
    %c0_3 = arith.constant 0 : index
    %c0_4 = arith.constant 0 : index
    %2 = vector.load %arg2[%c0_3, %c0_4] : memref<32x4xf32, #tpu.memory_space<vmem>>, vector<32x4xf32>
    %3 = vector.extract_strided_slice %2 {offsets = [0, 0], sizes = [32, 1], strides = [1, 1]} : vector<32x4xf32> to vector<32x1xf32>
    %4 = vector.extract_strided_slice %1 {offsets = [0, 0], sizes = [1, 512], strides = [1, 1]} : vector<4x512xf32> to vector<1x512xf32>
    %5 = vector.broadcast %3 : vector<32x1xf32> to vector<32x512xf32>
    %6 = vector.broadcast %4 : vector<1x512xf32> to vector<32x512xf32>
    %7 = arith.mulf %5, %6 : vector<32x512xf32>
    %8 = vector.broadcast %0 : vector<32x1xf32> to vector<32x512xf32>
    %9 = arith.addf %8, %7 : vector<32x512xf32>
    %10 = vector.extract_strided_slice %2 {offsets = [0, 1], sizes = [32, 1], strides = [1, 1]} : vector<32x4xf32> to vector<32x1xf32>
    %11 = vector.extract_strided_slice %1 {offsets = [1, 0], sizes = [1, 512], strides = [1, 1]} : vector<4x512xf32> to vector<1x512xf32>
    %12 = vector.broadcast %10 : vector<32x1xf32> to vector<32x512xf32>
    %13 = vector.broadcast %11 : vector<1x512xf32> to vector<32x512xf32>
    %14 = arith.mulf %12, %13 : vector<32x512xf32>
    %15 = arith.addf %9, %14 : vector<32x512xf32>
    %16 = vector.extract_strided_slice %2 {offsets = [0, 2], sizes = [32, 1], strides = [1, 1]} : vector<32x4xf32> to vector<32x1xf32>
    %17 = vector.extract_strided_slice %1 {offsets = [2, 0], sizes = [1, 512], strides = [1, 1]} : vector<4x512xf32> to vector<1x512xf32>
    %18 = vector.broadcast %16 : vector<32x1xf32> to vector<32x512xf32>
    %19 = vector.broadcast %17 : vector<1x512xf32> to vector<32x512xf32>
    %20 = arith.mulf %18, %19 : vector<32x512xf32>
    %21 = arith.addf %15, %20 : vector<32x512xf32>
    %22 = vector.extract_strided_slice %2 {offsets = [0, 3], sizes = [32, 1], strides = [1, 1]} : vector<32x4xf32> to vector<32x1xf32>
    %23 = vector.extract_strided_slice %1 {offsets = [3, 0], sizes = [1, 512], strides = [1, 1]} : vector<4x512xf32> to vector<1x512xf32>
    %24 = vector.broadcast %22 : vector<32x1xf32> to vector<32x512xf32>
    %25 = vector.broadcast %23 : vector<1x512xf32> to vector<32x512xf32>
    %26 = arith.mulf %24, %25 : vector<32x512xf32>
    %27 = arith.addf %21, %26 : vector<32x512xf32>
    %28 = arith.negf %27 : vector<32x512xf32>
    %29 = math.exp %28 : vector<32x512xf32>
    %cst = arith.constant 1.000000e+00 : f32
    %30 = vector.broadcast %cst : f32 to vector<32x512xf32>
    %31 = arith.addf %30, %29 : vector<32x512xf32>
    %32 = arith.divf %30, %31 : vector<32x512xf32>
    %33 = arith.mulf %27, %32 : vector<32x512xf32>
    %c0_5 = arith.constant 0 : index
    %c0_6 = arith.constant 0 : index
    %34 = vector.load %arg4[%c0_5, %c0_6] : memref<32x32xf32, #tpu.memory_space<vmem>>, vector<32x32xf32>
    %cst_7 = arith.constant dense<0.000000e+00> : vector<32x512xf32>
    %35 = tpu.matmul %34, %33, %cst_7 {dimension_numbers = #tpu.dot_dimension_numbers<[1], [0], [0], [1], [0, 0, 1, 1], [], []>, precision = #tpu.contract_precision<fp32>} : vector<32x32xf32>, vector<32x512xf32>, vector<32x512xf32> -> vector<32x512xf32>
    %c0_8 = arith.constant 0 : index
    %c0_9 = arith.constant 0 : index
    %36 = vector.load %arg5[%c0_8, %c0_9] : memref<32x1xf32, #tpu.memory_space<vmem>>, vector<32x1xf32>
    %37 = vector.broadcast %36 : vector<32x1xf32> to vector<32x512xf32>
    %38 = arith.addf %35, %37 : vector<32x512xf32>
    %c0_10 = arith.constant 0 : index
    %c0_11 = arith.constant 0 : index
    %39 = vector.load %arg6[%c0_10, %c0_11] : memref<32x512xf32, #tpu.memory_space<vmem>>, vector<32x512xf32>
    tpu.vector_store %arg6[%c0_10, %c0_11], %38 {strides = array<i32>} : memref<32x512xf32, #tpu.memory_space<vmem>>, vector<32x512xf32>,
    return
  }
  func.func @transform_0(%arg0: i32) -> (i32, i32) {
    %c0_i32 = arith.constant 0 : i32
    %c0_i32_0 = arith.constant 0 : i32
    return %c0_i32, %arg0 : i32, i32
  }
  func.func @transform_1(%arg0: i32) -> (i32, i32) {
    %c0_i32 = arith.constant 0 : i32
    %c0_i32_0 = arith.constant 0 : i32
    %c0_i32_1 = arith.constant 0 : i32
    return %c0_i32, %c0_i32_0 : i32, i32
  }
  func.func @transform_2(%arg0: i32) -> (i32, i32) {
    %c0_i32 = arith.constant 0 : i32
    %c0_i32_0 = arith.constant 0 : i32
    %c0_i32_1 = arith.constant 0 : i32
    return %c0_i32, %c0_i32_0 : i32, i32
  }
  func.func @transform_3(%arg0: i32) -> (i32, i32) {
    %c0_i32 = arith.constant 0 : i32
    %c0_i32_0 = arith.constant 0 : i32
    %c0_i32_1 = arith.constant 0 : i32
    return %c0_i32, %c0_i32_0 : i32, i32
  }
  func.func @transform_4(%arg0: i32) -> (i32, i32) {
    %c0_i32 = arith.constant 0 : i32
    %c0_i32_0 = arith.constant 0 : i32
    %c0_i32_1 = arith.constant 0 : i32
    return %c0_i32, %c0_i32_0 : i32, i32
  }
  func.func @transform_5(%arg0: i32) -> (i32, i32) {
    %c0_i32 = arith.constant 0 : i32
    %c0_i32_0 = arith.constant 0 : i32
    return %c0_i32, %arg0 : i32, i32
  }
}

</mosaic_0001>

<bundles_post_ra>
// kernel: tpu_custom_call.1
= control target key start
LH: loop header
LB: loop body
LE: loop exit
PB: predicated region body
PF: predicated region fallthrough
CT: control target
= control target key end

     0   :  { %v2276_v2 = vmov 0   ;;  %s2947_s0 = inlined_call_operand.vmem [shape: f32[4,512], index: 0, kind: input, shape index: {}]   ;;  %s2948_s1 = inlined_call_operand.vmem [shape: f32[32,4], index: 1, kind: input, shape index: {}]   ;;  %s2949_s2 = inlined_call_operand.vmem [shape: f32[32,1], index: 2, kind: input, shape index: {}]   ;;  %s2950_s3 = inlined_call_operand.vmem [shape: f32[32,32], index: 3, kind: input, shape index: {}]   ;;  %s2951_s4 = inlined_call_operand.vmem [shape: f32[32,1], index: 4, kind: input, shape index: {}]   ;;  %s2952_s5 = inlined_call_operand.hbm [shape: f32[32,512], index: 5, kind: output, shape index: {}]  }
   0x1   :  { %v27_v0 = vld [vmem:[%s2948_s1] sm:$0xff]  ;;  %2175 = vset.pattern.permute.xlu1 %v2276_v2  ;;  %2174 = vset.pattern.permute.xlu0 %v2276_v2  ;;  %v28_v3 = vld [vmem:[%s2948_s1 + $0x8] sm:$0xff] }
   0x2   :  { %v21_v1 = vld [vmem:[%s2949_s2] sm:$0xff]  ;;  %33 = vperm.xlu0 %2174, %v27_v0   ;;  %v22_v4 = vld [vmem:[%s2949_s2 + $0x8] sm:$0xff] }
   0x3   :  { %107 = vperm.xlu1 %2175, %v21_v1  }
   0x4   :  { %10 = vsyncpa [#allocation3], 0  ;;  %v30_v5 = vld [vmem:[%s2948_s1 + $0x18] sm:$0xff]  ;;  %v2277_v6 = vmov 1   ;;  %v23_v7 = vld [vmem:[%s2949_s2 + $0x10] sm:$0xff]  ;;  %v2278_v9 = vmov 2   ;;  %v53_v13 = vlaneseq }
   0x5   :  { %v29_v8 = vld [vmem:[%s2948_s1 + $0x10] sm:$0xff]  ;;  %v2279_v10 = vmov 3   ;;  %v24_v11 = vld [vmem:[%s2949_s2 + $0x18] sm:$0xff]  ;;  %v2280_v12 = vmov 0.0   ;;  %v25_v19 = vld [vmem:[%s2947_s0] sm:$0xff]  ;;  %vm533_vm0 = vcmask 261120  }
   0x6   :  { %38 = vperm.xlu0 %2174, %v28_v3   ;;  %618 = vmatprep.mubr.f32.mxu0 %v2280_v12  ;;  %v54_v14 = vshrl.u32 %v53_v13, 7  ;;  %v26_v20 = vld [vmem:[%s2947_s0 + $0x8] sm:$0xff]  ;;  %v505_v54 = vld [vmem:[%s2950_s3] sm:$0xff] }
   0x7   :  { %112 = vperm.xlu1 %2175, %v22_v4   ;;  %1308 = vmatprep.mubr.f32.mxu1 %v2280_v12  ;;  %v506_v55 = vld [vmem:[%s2950_s3 + $0x8] sm:$0xff] }
   0x8   :  { %v55_v17 = vsub.s32 0, %v54_v14  ;;  %v59_v18 = vsub.s32 4, %v54_v14  ;;  %v159_v21 = vsub.s32 1, %v54_v14  ;;  %v163_v24 = vsub.s32 5, %v54_v14 }
   0x9   :  { %v243_v26 = vsub.s32 2, %v54_v14  ;;  %v247_v27 = vsub.s32 6, %v54_v14  ;;  %v327_v32 = vsub.s32 3, %v54_v14  ;;  %v331_v33 = vsub.s32 7, %v54_v14 }
   0xa   :  { %48 = vperm.xlu0 %2174, %v30_v5   ;;  %v56_v25 = vrot.slane %v25_v19, %v55_v17  ;;  %v60_v28 = vrot.slane %v25_v19, %v59_v18  ;;  %v64_v29 = vrot.slane %v26_v20, %v55_v17  ;;  %v68_v30 = vrot.slane %v26_v20, %v59_v18 }
   0xb   :  { %2176 = vset.pattern.permute.xlu1 %v2277_v6  ;;  %v160_v31 = vrot.slane %v25_v19, %v159_v21  ;;  %v164_v35 = vrot.slane %v25_v19, %v163_v24  ;;  %v168_v36 = vrot.slane %v26_v20, %v159_v21  ;;  %v172_v37 = vrot.slane %v26_v20, %v163_v24 }
   0xc   :  { %146 = vperm.xlu1 %2176, %v28_v3   ;;  %v2352_v38 = vrot.slane %v56_v25, %v55_v17  ;;  %v244_v40 = vrot.slane %v25_v19, %v243_v26  ;;  %v248_v41 = vrot.slane %v25_v19, %v247_v27  ;;  %v2354_v42 = vrot.slane %v60_v28, %v55_v17 }
   0xd   :  { %v2356_v43 = vrot.slane %v64_v29, %v55_v17  ;;  %v252_v44 = vrot.slane %v26_v20, %v243_v26  ;;  %v256_v45 = vrot.slane %v26_v20, %v247_v27  ;;  %v2358_v46 = vrot.slane %v68_v30, %v55_v17 }
   0xe   :  { %117 = vperm.xlu0 %2174, %v23_v7   ;;  %v2360_v47 = vrot.slane %v160_v31, %v159_v21  ;;  %v328_v48 = vrot.slane %v25_v19, %v327_v32  ;;  %v332_v49 = vrot.slane %v25_v19, %v331_v33  ;;  %v2362_v50 = vrot.slane %v164_v35, %v159_v21 }
   0xf   :  { %v2364_v51 = vrot.slane %v168_v36, %v159_v21  ;;  %v2366_v52 = vrot.slane %v172_v37, %v159_v21  ;;  %v2376_v56 = vrot.slane %v244_v40, %v243_v26  ;;  %v2378_v57 = vrot.slane %v248_v41, %v243_v26 }
  0x10   :  { %2177 = vset.pattern.permute.xlu1 %v2276_v2  ;;  %v336_v58 = vrot.slane %v26_v20, %v327_v32  ;;  %v340_v59 = vrot.slane %v26_v20, %v331_v33  ;;  %v2382_v63 = vrot.slane %v252_v44, %v243_v26  ;;  %v2386_v1 = vrot.slane %v328_v48, %v327_v32 }
  0x11   :  { %43 = vperm.xlu1 %2177, %v29_v8   ;;  %v2394_v4 = vsel %vm533_vm0, %v506_v55, 0 }
  0x12   :  { %2179 = vset.pattern.permute.xlu0 %v2277_v6  ;;  %v2402_v13 = vrot.slane %v336_v58, %v327_v32  ;;  %v2404_v14 = vrot.slane %v340_v59, %v327_v32 }
  0x13   :  { %142 = vperm.xlu0 %2179, %v27_v0  }
  0x15   :  { %2178 = vset.pattern.permute.xlu1 %v2278_v9 }
  0x16   :  { %226 = vperm.xlu1 %2178, %v27_v0  }
  0x17   :  { %150 = vperm.xlu0 %2179, %v29_v8  }
  0x1a   :  { %230 = vperm.xlu1 %2178, %v28_v3  }
  0x1b   :  { %2183 = vset.pattern.permute.xlu0 %v2279_v10 }
  0x1c   :  { %314 = vperm.xlu0 %2183, %v28_v3   ;;  %v2391_v3 = vsel %vm533_vm0, %v505_v54, 0 }
  0x1d   :  { %v2409_v19 = vand.u32 4294901760, %v2391_v3 }
  0x1e   :  { %2180 = vset.pattern.permute.xlu1 %v2276_v2 }
  0x1f   :  { %122 = vperm.xlu1 %2180, %v24_v11  }
  0x20   :  { %318 = vperm.xlu0 %2183, %v29_v8  }
  0x23   :  { %2181 = vset.pattern.permute.xlu1 %v2277_v6 }
  0x24   :  { %154 = vperm.xlu1 %2181, %v30_v5   ;;  %2186 = vset.pattern.permute.xlu0 %v2276_v2 }
  0x28   :  { %2182 = vset.pattern.permute.xlu1 %v2279_v10 }
  0x29   :  { %310 = vperm.xlu1 %2182, %v27_v0   ;;  %v2384_v0 = vrot.slane %v256_v45, %v243_v26 }
  0x2d   :  { %2184 = vset.pattern.permute.xlu1 %v2278_v9 }
  0x2e   :  { %234 = vperm.xlu1 %2184, %v29_v8  }
  0x32   :  { %238 = vperm.xlu1 %2184, %v30_v5  }
  0x36   :  { %2185 = vset.pattern.permute.xlu1 %v2279_v10 }
  0x37   :  { %322 = vperm.xlu1 %2185, %v30_v5  }
  0x3b   :  { %2187 = vset.pattern.permute.xlu1 %v2276_v2  ;;  %v2388_v2 = vrot.slane %v332_v49, %v327_v32 }
  0x81   :  { %v34_v15 = vpop.permute.xlu0 %33 }
  0x82   :  { %v2340_v16 = vpop.permute.xlu1 %107  ;;  %v89_v60 = vmul.f32 %v2352_v38, %v34_v15  ;;  %v90_v61 = vmul.f32 %v2354_v42, %v34_v15  ;;  %v91_v5 = vmul.f32 %v2356_v43, %v34_v15  ;;  %v92_v6 = vmul.f32 %v2358_v46, %v34_v15 }
  0x83   :  { %v2412_v15 = vand.u32 4294901760, %v2394_v4 }
  0x84   :  { %v125_v17 = vadd.f32 %v2340_v16, %v89_v60  ;;  %v126_v18 = vadd.f32 %v2340_v16, %v90_v61  ;;  %v127_v26 = vadd.f32 %v2340_v16, %v91_v5  ;;  %v128_v27 = vadd.f32 %v2340_v16, %v92_v6 }
  0x85   :  { %v39_v22 = vpop.permute.xlu0 %38 }
  0x86   :  { %v2348_v23 = vpop.permute.xlu1 %112  ;;  %v93_v7 = vmul.f32 %v2352_v38, %v39_v22  ;;  %v94_v8 = vmul.f32 %v2354_v42, %v39_v22  ;;  %v95_v9 = vmul.f32 %v2356_v43, %v39_v22  ;;  %v96_v10 = vmul.f32 %v2358_v46, %v39_v22 }
  0x88   :  { %v129_v28 = vadd.f32 %v2348_v23, %v93_v7  ;;  %v130_v29 = vadd.f32 %v2348_v23, %v94_v8  ;;  %v131_v30 = vadd.f32 %v2348_v23, %v95_v9  ;;  %v132_v31 = vadd.f32 %v2348_v23, %v96_v10 }
  0x89   :  { %v2350_v34 = vpop.permute.xlu0 %48 }
  0x8a   :  { %v2426_v32 = vmul.f32 %v2352_v38, %v2350_v34  ;;  %v2430_v33 = vmul.f32 %v2354_v42, %v2350_v34  ;;  %v2434_v16 = vmul.f32 %v2356_v43, %v2350_v34  ;;  %v2438_v36 = vmul.f32 %v2358_v46, %v2350_v34 }
  0x8b   :  { %v147_v39 = vpop.permute.xlu1 %146 }
  0x8c   :  { %v197_v20 = vmul.f32 %v2360_v47, %v147_v39  ;;  %v198_v21 = vmul.f32 %v2362_v50, %v147_v39  ;;  %v199_v22 = vmul.f32 %v2364_v51, %v147_v39  ;;  %v200_v24 = vmul.f32 %v2366_v52, %v147_v39 }
  0x8d   :  { %v2368_v53 = vpop.permute.xlu0 %117 }
  0x8e   :  { %v213_v39 = vadd.f32 %v197_v20, %v129_v28  ;;  %v214_v40 = vadd.f32 %v198_v21, %v130_v29  ;;  %v215_v41 = vadd.f32 %v199_v22, %v131_v30  ;;  %v216_v44 = vadd.f32 %v200_v24, %v132_v31 }
  0x90   :  { %v44_v62 = vpop.permute.xlu1 %43 }
  0x91   :  { %v97_v48 = vmul.f32 %v2352_v38, %v44_v62  ;;  %v98_v49 = vmul.f32 %v2354_v42, %v44_v62  ;;  %v99_v61 = vmul.f32 %v2356_v43, %v44_v62  ;;  %v100_v5 = vmul.f32 %v2358_v46, %v44_v62 }
  0x92   :  { %v143_v11 = vpop.permute.xlu0 %142 }
  0x93   :  { %v193_v37 = vmul.f32 %v2360_v47, %v143_v11  ;;  %v194_v23 = vmul.f32 %v2362_v50, %v143_v11  ;;  %v195_v54 = vmul.f32 %v2364_v51, %v143_v11  ;;  %v196_v55 = vmul.f32 %v2366_v52, %v143_v11 }
  0x95   :  { %v227_v25 = vpop.permute.xlu1 %226  ;;  %v209_v6 = vadd.f32 %v193_v37, %v125_v17  ;;  %v210_v38 = vadd.f32 %v194_v23, %v126_v18  ;;  %v211_v28 = vadd.f32 %v195_v54, %v127_v26  ;;  %v212_v43 = vadd.f32 %v196_v55, %v128_v27 }
  0x96   :  { %v151_v35 = vpop.permute.xlu0 %150  ;;  %v277_v46 = vmul.f32 %v2376_v56, %v227_v25  ;;  %v278_v62 = vmul.f32 %v2378_v57, %v227_v25  ;;  %v279_v31 = vmul.f32 %v2382_v63, %v227_v25  ;;  %v280_v37 = vmul.f32 %v2384_v0, %v227_v25 }
  0x97   :  { %v201_v23 = vmul.f32 %v2360_v47, %v151_v35  ;;  %v202_v26 = vmul.f32 %v2362_v50, %v151_v35  ;;  %v203_v27 = vmul.f32 %v2364_v51, %v151_v35  ;;  %v204_v54 = vmul.f32 %v2366_v52, %v151_v35 }
  0x99   :  { %v231_v45 = vpop.permute.xlu1 %230 }
  0x9a   :  { %v281_v34 = vmul.f32 %v2376_v56, %v231_v45  ;;  %v282_v58 = vmul.f32 %v2378_v57, %v231_v45  ;;  %v283_v59 = vmul.f32 %v2382_v63, %v231_v45  ;;  %v284_v60 = vmul.f32 %v2384_v0, %v231_v45 }
  0x9b   :  { %v315_v7 = vpop.permute.xlu0 %314  ;;  %v134_v45 = vadd.f32 %v2368_v53, %v98_v49 }
  0x9c   :  { %v297_v42 = vadd.f32 %v281_v34, %v213_v39  ;;  %v298_v8 = vadd.f32 %v282_v58, %v214_v40  ;;  %v299_v9 = vadd.f32 %v283_v59, %v215_v41  ;;  %v300_v10 = vadd.f32 %v284_v60, %v216_v44 }
  0x9d   :  { %v365_v11 = vmul.f32 %v2386_v1, %v315_v7  ;;  %v366_v20 = vmul.f32 %v2388_v2, %v315_v7  ;;  %v367_v21 = vmul.f32 %v2402_v13, %v315_v7  ;;  %v368_v22 = vmul.f32 %v2404_v14, %v315_v7 }
  0x9e   :  { %v123_v24 = vpop.permute.xlu1 %122  ;;  %v133_v44 = vadd.f32 %v2368_v53, %v97_v48  ;;  %v135_v34 = vadd.f32 %v2368_v53, %v99_v61  ;;  %v136_v58 = vadd.f32 %v2368_v53, %v100_v5  ;;  %v293_v59 = vadd.f32 %v277_v46, %v209_v6 }
  0x9f   :  { %v2458_v17 = vadd.f32 %v365_v11, %v297_v42  ;;  %v2460_v18 = vadd.f32 %v366_v20, %v298_v8  ;;  %v2462_v29 = vadd.f32 %v367_v21, %v299_v9  ;;  %v2464_v30 = vadd.f32 %v368_v22, %v300_v10  ;;  %v319_v11 = vpop.permute.xlu0 %318 }
  0xa0   :  { %v294_v60 = vadd.f32 %v278_v62, %v210_v38  ;;  %v295_v7 = vadd.f32 %v279_v31, %v211_v28  ;;  %v296_v42 = vadd.f32 %v280_v37, %v212_v43  ;;  %v217_v8 = vadd.f32 %v201_v23, %v133_v44 }
  0xa1   :  { %v1962_v39 = vmul.f32 -1.442695, %v2458_v17  ;;  %v1963_v40 = vmul.f32 -1.442695, %v2460_v18  ;;  %v1964_v41 = vmul.f32 -1.442695, %v2462_v29  ;;  %v218_v9 = vadd.f32 %v202_v26, %v134_v45 }
  0xa2   :  { %v1965_v25 = vmul.f32 -1.442695, %v2464_v30  ;;  %v219_v48 = vadd.f32 %v203_v27, %v135_v34  ;;  %v220_v49 = vadd.f32 %v204_v54, %v136_v58  ;;  %v137_v35 = vadd.f32 %v123_v24, %v2426_v32 }
  0xa3   :  { %v155_v55 = vpop.permute.xlu1 %154  ;;  %2188 = vpow2.f32 %v1962_v39  ;;  %v138_v10 = vadd.f32 %v123_v24, %v2430_v33  ;;  %v139_v33 = vadd.f32 %v123_v24, %v2434_v16  ;;  %v140_v28 = vadd.f32 %v123_v24, %v2438_v36 }
  0xa4   :  { %2190 = vpow2.f32 %v1963_v40  ;;  %v205_v61 = vmul.f32 %v2360_v47, %v155_v55  ;;  %v206_v53 = vmul.f32 %v2362_v50, %v155_v55  ;;  %v207_v5 = vmul.f32 %v2364_v51, %v155_v55 }
  0xa5   :  { %2192 = vpow2.f32 %v1964_v41  ;;  %v208_v6 = vmul.f32 %v2366_v52, %v155_v55  ;;  %v369_v47 = vmul.f32 %v2386_v1, %v319_v11  ;;  %v370_v50 = vmul.f32 %v2388_v2, %v319_v11 }
  0xa6   :  { %2194 = vpow2.f32 %v1965_v25  ;;  %v221_v62 = vadd.f32 %v205_v61, %v137_v35  ;;  %v222_v31 = vadd.f32 %v206_v53, %v138_v10  ;;  %v371_v37 = vmul.f32 %v2402_v13, %v319_v11 }
  0xa7   :  { %v372_v16 = vmul.f32 %v2404_v14, %v319_v11  ;;  %v223_v23 = vadd.f32 %v207_v5, %v139_v33  ;;  %v224_v36 = vadd.f32 %v208_v6, %v140_v28 }
  0xa8   :  { %v311_v38 = vpop.permute.xlu1 %310 }
  0xa9   :  { %v361_v20 = vmul.f32 %v2386_v1, %v311_v38  ;;  %v362_v21 = vmul.f32 %v2388_v2, %v311_v38  ;;  %v363_v22 = vmul.f32 %v2402_v13, %v311_v38  ;;  %v364_v32 = vmul.f32 %v2404_v14, %v311_v38 }
  0xab   :  { %v2494_v51 = vadd.f32 %v361_v20, %v293_v59  ;;  %v2496_v52 = vadd.f32 %v362_v21, %v294_v60  ;;  %v2498_v43 = vadd.f32 %v363_v22, %v295_v7  ;;  %v2500_v46 = vadd.f32 %v364_v32, %v296_v42 }
  0xad   :  { %v1958_v24 = vmul.f32 -1.442695, %v2494_v51  ;;  %v1959_v26 = vmul.f32 -1.442695, %v2496_v52  ;;  %v235_v27 = vpop.permute.xlu1 %234  ;;  %v2189_v39 = vpop.eup %2188  ;;  %v1960_v40 = vmul.f32 -1.442695, %v2498_v43 }
  0xae   :  { %v285_v41 = vmul.f32 %v2376_v56, %v235_v27  ;;  %v286_v44 = vmul.f32 %v2378_v57, %v235_v27  ;;  %v287_v45 = vmul.f32 %v2382_v63, %v235_v27  ;;  %v2191_v54 = vpop.eup %2190  ;;  %v445_v25 = vadd.f32 1.0, %v2189_v39 }
  0xaf   :  { %2196 = vpow2.f32 %v1958_v24  ;;  %v1961_v55 = vmul.f32 -1.442695, %v2500_v46  ;;  %v288_v34 = vmul.f32 %v2384_v0, %v235_v27  ;;  %v2193_v58 = vpop.eup %2192  ;;  %v446_v59 = vadd.f32 1.0, %v2191_v54 }
  0xb0   :  { %2198 = vpow2.f32 %v1959_v26  ;;  %v301_v60 = vadd.f32 %v285_v41, %v217_v8  ;;  %v302_v7 = vadd.f32 %v286_v44, %v218_v9  ;;  %v2195_v42 = vpop.eup %2194  ;;  %v447_v35 = vadd.f32 1.0, %v2193_v58 }
  0xb1   :  { %2200 = vrcp.f32 %v445_v25  ;;  %v303_v10 = vadd.f32 %v287_v45, %v219_v48  ;;  %v304_v11 = vadd.f32 %v288_v34, %v220_v49  ;;  %v239_v61 = vpop.permute.xlu1 %238  ;;  %v448_v53 = vadd.f32 1.0, %v2195_v42 }
  0xb2   :  { %2202 = vrcp.f32 %v446_v59  ;;  %v2512_v5 = vadd.f32 %v369_v47, %v301_v60  ;;  %v2514_v6 = vadd.f32 %v370_v50, %v302_v7  ;;  %v289_v8 = vmul.f32 %v2376_v56, %v239_v61  ;;  %v509_v60 = vld [vmem:[%s2951_s4] sm:$0xff] }
  0xb3   :  { %2204 = vrcp.f32 %v447_v35  ;;  %v2516_v38 = vadd.f32 %v371_v37, %v303_v10  ;;  %v2518_v20 = vadd.f32 %v372_v16, %v304_v11  ;;  %v290_v49 = vmul.f32 %v2378_v57, %v239_v61  ;;  %515 = vperm.xlu0 %2186, %v509_v60  }
  0xb4   :  { %2206 = vrcp.f32 %v448_v53  ;;  %v1966_v9 = vmul.f32 -1.442695, %v2512_v5  ;;  %v1967_v48 = vmul.f32 -1.442695, %v2514_v6  ;;  %v291_v32 = vmul.f32 %v2382_v63, %v239_v61  ;;  %v508_v53 = vld [vmem:[%s2950_s3 + $0x18] sm:$0xff] }
  0xb5   :  { %2208 = vpow2.f32 %v1960_v40  ;;  %v1968_v21 = vmul.f32 -1.442695, %v2516_v38  ;;  %v1969_v22 = vmul.f32 -1.442695, %v2518_v20  ;;  %v292_v33 = vmul.f32 %v2384_v0, %v239_v61 }
  0xb6   :  { %2210 = vpow2.f32 %v1961_v55  ;;  %v305_v28 = vadd.f32 %v289_v8, %v221_v62  ;;  %v306_v47 = vadd.f32 %v290_v49, %v222_v31  ;;  %v323_v56 = vpop.permute.xlu1 %322  ;;  %v307_v50 = vadd.f32 %v291_v32, %v223_v23  ;;  %v507_v55 = vld [vmem:[%s2950_s3 + $0x10] sm:$0xff]  ;;  %s2281_s3 = smov [#allocation2]  }
  0xb7   :  { %2212 = vpow2.f32 %v1966_v9  ;;  %v373_v37 = vmul.f32 %v2386_v1, %v323_v56  ;;  %v374_v16 = vmul.f32 %v2388_v2, %v323_v56  ;;  %v308_v57 = vadd.f32 %v292_v33, %v224_v36  ;;  %v511_v8 = vld [vmem:[%s2951_s4 + $0x10] sm:$0xff]  ;;  %v512_v9 = vld [vmem:[%s2951_s4 + $0x18] sm:$0xff] }
  0xb8   :  { %2214 = vpow2.f32 %v1967_v48  ;;  %v375_v24 = vmul.f32 %v2402_v13, %v323_v56  ;;  %v376_v26 = vmul.f32 %v2404_v14, %v323_v56  ;;  %v2538_v62 = vsub.f32 %v2391_v3, %v2409_v19  ;;  %530 = vperm.xlu0 %2186, %v512_v9  }
  0xb9   :  { %v2197_v27 = vpop.eup %2196  ;;  %2216 = vpow2.f32 %v1968_v21  ;;  %v2532_v63 = vadd.f32 %v373_v37, %v305_v28  ;;  %v2534_v0 = vadd.f32 %v374_v16, %v306_v47  ;;  %v2548_v40 = vsub.f32 %v2394_v4, %v2412_v15 }
  0xba   :  { %v2199_v31 = vpop.eup %2198  ;;  %v441_v1 = vadd.f32 1.0, %v2197_v27  ;;  %2218 = vpow2.f32 %v1969_v22  ;;  %v2540_v2 = vadd.f32 %v375_v24, %v307_v50  ;;  %v2542_v23 = vadd.f32 %v376_v26, %v308_v57 }
  0xbb   :  { %v2201_v13 = vpop.eup %2200  ;;  %v442_v36 = vadd.f32 1.0, %v2199_v31  ;;  %v1970_v14 = vmul.f32 -1.442695, %v2532_v63  ;;  %v1971_v39 = vmul.f32 -1.442695, %v2534_v0  ;;  %v544_v16 = vsel %vm533_vm0, %v508_v53, 0 }
  0xbc   :  { %v2203_v41 = vpop.eup %2202  ;;  %2220 = vrcp.f32 %v441_v1  ;;  %v1972_v3 = vmul.f32 -1.442695, %v2540_v2  ;;  %v1973_v45 = vmul.f32 -1.442695, %v2542_v23  ;;  %v2556_v25 = vmul.f32 %v2201_v13, %v2458_v17 }
  0xbd   :  { %v2205_v44 = vpop.eup %2204  ;;  %2222 = vrcp.f32 %v442_v36  ;;  %v2553_v54 = vmul.f32 %v2203_v41, %v2460_v18  ;;  %v2568_v18 = vand.u32 4294901760, %v2538_v62  ;;  %v2571_v17 = vand.u32 4294901760, %v2548_v40 }
  0xbe   :  { %v2207_v4 = vpop.eup %2206  ;;  %2224 = vpow2.f32 %v1970_v14  ;;  %v2562_v34 = vmul.f32 %v2205_v44, %v2462_v29  ;;  %v510_v29 = vld [vmem:[%s2951_s4 + $0x8] sm:$0xff]  ;;  %v552_v61 = vand.u32 4294901760, %v2556_v25  ;;  %s1947_s4 = sshll.u32 %s2281_s3, 4  ;;  %s1948_s4 = int_to_ptr.vmem [resolvable:$true] %s1947_s4 }
  0xbf   :  { %v2209_v58 = vpop.eup %2208  ;;  %2226 = vpow2.f32 %v1971_v39  ;;  %v2565_v59 = vmul.f32 %v2207_v4, %v2464_v30  ;;  %v541_v30 = vsel %vm533_vm0, %v507_v55, 0  ;;  %520 = vperm.xlu1 %2187, %v510_v29   ;;  %v550_v11 = vand.u32 4294901760, %v2553_v54  ;;  %s2252_s26 = scalar_lea.vmem %s1948_s4, 2048  ;;  %p2257_p1 = scmp.lt.s32.totalorder %s1948_s4, %s1948_s4 }
  0xc0   :  { %v2211_v7 = vpop.eup %2210  ;;  %v443_v42 = vadd.f32 1.0, %v2209_v58  ;;  %2228 = vpow2.f32 %v1972_v3  ;;  %v1242_v22 = vand.u32 4294901760, %v2562_v34  ;;  %v622_v28 = vsub.f32 %v2538_v62, %v2568_v18  ;;  %p2253_p0 = scmp.ne.s32.totalorder %s1948_s4, %s2252_s26  ;;  %p2258_p2 = scmp.lt.s32.totalorder %s2252_s26, %s2252_s26 }
  0xc1   :  { %v2213_v35 = vpop.eup %2212  ;;  %v444_v10 = vadd.f32 1.0, %v2211_v7  ;;  %2230 = vpow2.f32 %v1973_v45  ;;  %v1240_v21 = vand.u32 4294901760, %v2565_v59  ;;  %v633_v47 = vsub.f32 %v2548_v40, %v2571_v17 }
  0xc2   :  { %v2215_v48 = vpop.eup %2214  ;;  %2232 = vrcp.f32 %v443_v42  ;;  %v449_v49 = vadd.f32 1.0, %v2213_v35  ;;  %v2597_v37 = vand.u32 4294901760, %v541_v30  ;;  %v2601_v24 = vsub.f32 %v2553_v54, %v550_v11  ;;  %p2259_p3 = por %p2258_p2, %p2257_p1 }
  0xc3   :  { %v2217_v32 = vpop.eup %2216  ;;  %2234 = vrcp.f32 %v444_v10  ;;  %v450_v33 = vadd.f32 1.0, %v2215_v48  ;;  %525 = vperm.xlu1 %2187, %v511_v8   ;;  %v2604_v26 = vsub.f32 %v2556_v25, %v552_v61  ;;  %v2609_v31 = vsub.f32 %v2565_v59, %v1240_v21 }
  0xc4   :  { %v2219_v56 = vpop.eup %2218  ;;  %v451_v50 = vadd.f32 1.0, %v2217_v32  ;;  %2236 = vrcp.f32 %v449_v49  ;;  %v2614_v1 = vsub.f32 %v2562_v34, %v1242_v22  ;;  %v2617_v14 = vand.u32 4294901760, %v622_v28  ;;  %p2260_p4 = pnand %p2259_p3, %p2253_p0 }
  0xc5   :  { %v452_v57 = vadd.f32 1.0, %v2219_v56  ;;  %2238 = vrcp.f32 %v450_v33  ;;  %v2620_v3 = vand.u32 4294901760, %v633_v47  ;;  %v2623_v44 = vsub.f32 %v541_v30, %v2597_v37 }
  0xc6   :  { %v2221_v27 = vpop.eup %2220  ;;  %2240 = vrcp.f32 %v451_v50  ;;  %v2625_v45 = vand.u32 4294901760, %v544_v16  ;;  %v2959_v4 = vand.u32 4294901760, %v2601_v24  ;;  %v2954_v58 = vand.u32 4294901760, %v2604_v26 }
  0xc7   :  { %v2223_v13 = vpop.eup %2222  ;;  %2242 = vrcp.f32 %v452_v57  ;;  %v489_v36 = vmul.f32 %v2221_v27, %v2494_v51  ;;  %v2956_v7 = vand.u32 4294901760, %v2609_v31  ;;  %v2641_v33 = vand.u32 4294901760, %v2623_v44 }
  0xc8   :  { %v2225_v39 = vpop.eup %2224  ;;  %v490_v41 = vmul.f32 %v2223_v13, %v2496_v52  ;;  %v2953_v52 = vand.u32 4294901760, %v2614_v1  ;;  %v2644_v28 = vsub.f32 %v544_v16, %v2625_v45 }
  0xc9   :  { %v2227_v54 = vpop.eup %2226  ;;  %v453_v25 = vadd.f32 1.0, %v2225_v39  ;;  %v548_v55 = vand.u32 4294901760, %v489_v36  ;;  %v2666_v39 = vsub.f32 %v2609_v31, %v2956_v7 }
  0xca   :  { %v2229_v51 = vpop.eup %2228  ;;  %v454_v60 = vadd.f32 1.0, %v2227_v54  ;;  %v546_v29 = vand.u32 4294901760, %v490_v41 }
  0xcb   :  { %v2231_v42 = vpop.eup %2230  ;;  %v455_v35 = vadd.f32 1.0, %v2229_v51  ;;  %2244 = vrcp.f32 %v453_v25  ;;  %v2631_v30 = vpack.c.bf16 %v552_v61, %v548_v55  ;;  %v2633_v10 = vsub.f32 %v489_v36, %v548_v55 }
  0xcc   :  { %v2233_v53 = vpop.eup %2232  ;;  %v456_v8 = vadd.f32 1.0, %v2231_v42  ;;  %2246 = vrcp.f32 %v454_v60  ;;  %v2635_v9 = vpack.c.bf16 %v550_v11, %v546_v29  ;;  %v2637_v48 = vsub.f32 %v490_v41, %v546_v29 }
  0xcd   :  { %v2235_v49 = vpop.eup %2234  ;;  %2248 = vrcp.f32 %v455_v35  ;;  %v491_v32 = vmul.f32 %v2233_v53, %v2498_v43  ;;  %v2651_v11 = vsub.f32 %v2601_v24, %v2959_v4  ;;  %v2656_v43 = vsub.f32 %v2604_v26, %v2954_v58 }
  0xce   :  { %v2237_v61 = vpop.eup %2236  ;;  %2250 = vrcp.f32 %v456_v8  ;;  %1975 = vmatprep.subr.bf16.mxu0 %v2635_v9  ;;  %v492_v47 = vmul.f32 %v2235_v49, %v2500_v46  ;;  %v2960_v57 = vand.u32 4294901760, %v2637_v48  ;;  %v2955_v46 = vand.u32 4294901760, %v2633_v10 }
  0xcf   :  { %v2239_v56 = vpop.eup %2238  ;;  %1977 = vmatpush1.bf16.msra.mxu0 %v2631_v30  ;;  %v1238_v50 = vand.u32 4294901760, %v491_v32  ;;  %v497_v16 = vmul.f32 %v2237_v61, %v2512_v5  ;;  %v2671_v41 = vsub.f32 %v2614_v1, %v2953_v52  ;;  %v679_v61 = vand.u32 4294901760, %v2651_v11 }
  0xd0   :  { %v2241_v27 = vpop.eup %2240  ;;  %v1236_v13 = vand.u32 4294901760, %v492_v47  ;;  %v498_v36 = vmul.f32 %v2239_v56, %v2514_v6  ;;  %v666_v34 = vsub.f32 %v2637_v48, %v2960_v57 }
  0xd1   :  { %v2243_v54 = vpop.eup %2242  ;;  %v2675_v5 = vpack.c.bf16 %v1242_v22, %v1238_v50  ;;  %v2677_v25 = vsub.f32 %v491_v32, %v1238_v50  ;;  %v556_v55 = vand.u32 4294901760, %v497_v16  ;;  %v499_v6 = vmul.f32 %v2241_v27, %v2516_v38 }
  0xd2   :  { %v2682_v51 = vpack.c.bf16 %v1240_v21, %v1236_v13  ;;  %v2684_v60 = vsub.f32 %v492_v47, %v1236_v13  ;;  %v554_v29 = vand.u32 4294901760, %v498_v36  ;;  %v500_v42 = vmul.f32 %v2243_v54, %v2518_v20 }
  0xd3   :  { %v1246_v35 = vand.u32 4294901760, %v499_v6  ;;  %v672_v22 = vsub.f32 %v2633_v10, %v2955_v46  ;;  %v644_v38 = vsub.f32 %v2623_v44, %v2641_v33  ;;  %v2696_v21 = vsub.f32 %v497_v16, %v556_v55 }
  0xd4   :  { %2023 = vmatprep.subr.bf16.mxu1 %v2682_v51  ;;  %v1244_v59 = vand.u32 4294901760, %v500_v42  ;;  %v2958_v53 = vand.u32 4294901760, %v2684_v60  ;;  %v2957_v20 = vand.u32 4294901760, %v2677_v25  ;;  %v2701_v49 = vsub.f32 %v498_v36, %v554_v29 }
  0xd5   :  { %v2245_v8 = vpop.eup %2244  ;;  %2025 = vmatpush1.bf16.msra.mxu1 %v2675_v5  ;;  %v2703_v32 = vsub.f32 %v499_v6, %v1246_v35  ;;  %v685_v47 = vand.u32 4294901760, %v2656_v43  ;;  %v1369_v27 = vand.u32 4294901760, %v2666_v39  ;;  %v1375_v13 = vand.u32 4294901760, %v2671_v41 }
  0xd6   :  { %v2247_v56 = vpop.eup %2246  ;;  %v501_v50 = vmul.f32 %v2245_v8, %v2532_v63  ;;  %v1356_v16 = vsub.f32 %v2684_v60, %v2958_v53  ;;  %v2714_v6 = vsub.f32 %v500_v42, %v1244_v59  ;;  %v667_v52 = vand.u32 4294901760, %v666_v34 }
  0xd7   :  { %v2249_v54 = vpop.eup %2248  ;;  %v502_v36 = vmul.f32 %v2247_v56, %v2534_v0  ;;  %v673_v11 = vand.u32 4294901760, %v672_v22  ;;  %v1362_v63 = vsub.f32 %v2677_v25, %v2957_v20  ;;  %v2964_v8 = vand.u32 4294901760, %v2696_v21 }
  0xd8   :  { %v2251_v58 = vpop.eup %2250  ;;  %v560_v43 = vand.u32 4294901760, %v501_v50  ;;  %v503_v46 = vmul.f32 %v2249_v54, %v2540_v2  ;;  %v689_v7 = vand.u32 4294901760, %v2701_v49  ;;  %v2961_v0 = vand.u32 4294901760, %v2703_v32 }
  0xd9   :  { %v558_v39 = vand.u32 4294901760, %v502_v36  ;;  %v504_v41 = vmul.f32 %v2251_v58, %v2542_v23  ;;  %v1357_v56 = vand.u32 4294901760, %v1356_v16  ;;  %v2965_v53 = vand.u32 4294901760, %v2714_v6 }
  0xda   :  { %v2724_v42 = vpack.c.bf16 %v560_v43, %v556_v55  ;;  %v2726_v34 = vsub.f32 %v501_v50, %v560_v43  ;;  %v1250_v22 = vand.u32 4294901760, %v503_v46  ;;  %v1982_v58 = vpack.c.bf16 %v679_v61, %v667_v52 }
  0xdb   :  { %v2728_v2 = vpack.c.bf16 %v558_v39, %v554_v29  ;;  %v2730_v54 = vsub.f32 %v502_v36, %v558_v39  ;;  %v1248_v20 = vand.u32 4294901760, %v504_v41  ;;  %v1363_v57 = vand.u32 4294901760, %v1362_v63 }
  0xdc   :  { %v2733_v4 = vpack.c.bf16 %v1250_v22, %v1246_v35  ;;  %v2735_v23 = vsub.f32 %v503_v46, %v1250_v22  ;;  %v690_v29 = vsub.f32 %v2701_v49, %v689_v7  ;;  %v696_v46 = vsub.f32 %v2696_v21, %v2964_v8 }
  0xdd   :  { %1979 = vmatprep.subr.bf16.mxu0 %v2728_v2  ;;  %v2738_v55 = vpack.c.bf16 %v1248_v20, %v1244_v59  ;;  %v2740_v50 = vsub.f32 %v504_v41, %v1248_v20  ;;  %v701_v16 = vand.u32 4294901760, %v2730_v54  ;;  %v2962_v52 = vand.u32 4294901760, %v2726_v34 }
  0xde   :  { %1981 = vmatpush1.bf16.msra.mxu0 %v2724_v42  ;;  %v1386_v35 = vsub.f32 %v2703_v32, %v2961_v0  ;;  %v2963_v59 = vand.u32 4294901760, %v2735_v23  ;;  %v2030_v20 = vpack.c.bf16 %v1369_v27, %v1357_v56  ;;  %v1380_v36 = vsub.f32 %v2714_v6, %v2965_v53 }
  0xdf   :  { %2027 = vmatprep.subr.bf16.mxu1 %v2738_v55  ;;  %1983 = vmatprep.subr.bf16.mxu0 %v1982_v58  ;;  %v702_v61 = vsub.f32 %v2730_v54, %v701_v16  ;;  %v1391_v43 = vand.u32 4294901760, %v2740_v50  ;;  %v1984_v63 = vpack.c.bf16 %v685_v47, %v673_v11  ;;  %v708_v39 = vsub.f32 %v2726_v34, %v2962_v52 }
  0xe0   :  { %2029 = vmatpush1.bf16.msra.mxu1 %v2733_v4  ;;  %v1398_v27 = vsub.f32 %v2735_v23, %v2963_v59  ;;  %v2771_v41 = vand.u32 4294901760, %v2644_v28  ;;  %v2032_v22 = vpack.c.bf16 %v1375_v13, %v1363_v57  ;;  %v691_v56 = vand.u32 4294901760, %v690_v29 }
  0xe1   :  { %2031 = vmatprep.subr.bf16.mxu1 %v2030_v20  ;;  %624 = vmatmul.mubr.f32.vlgmr.msra.gmra.mrb[0].mxu0 %v2617_v14  ;;  %v703_v58 = vand.u32 4294901760, %v702_v61  ;;  %v1392_v47 = vsub.f32 %v2740_v50, %v1391_v43  ;;  %v697_v11 = vand.u32 4294901760, %v696_v46  ;;  %v709_v0 = vand.u32 4294901760, %v708_v39 }
  0xe2   :  { %1985 = vmatpush1.bf16.msra.mxu0 %v1984_v63  ;;  %629 = vmatprep.mubr.f32.mxu0 %v2280_v12  ;;  %v1387_v52 = vand.u32 4294901760, %v1386_v35  ;;  %v1399_v59 = vand.u32 4294901760, %v1398_v27  ;;  %v1381_v20 = vand.u32 4294901760, %v1380_v36  ;;  %v1990_v46 = vpack.c.bf16 %v2601_v24, %v2637_v48 }
  0xe3   :  { %1314 = vmatmul.mubr.f32.vlgmr.msra.gmra.mrb[0].mxu1 %v2617_v14  ;;  %v1986_v8 = vpack.c.bf16 %v703_v58, %v691_v56  ;;  %v1393_v53 = vand.u32 4294901760, %v1392_v47  ;;  %v1988_v57 = vpack.c.bf16 %v709_v0, %v697_v11  ;;  %v645_v14 = vand.u32 4294901760, %v644_v38 }
  0xe4   :  { %2033 = vmatpush1.bf16.msra.mxu1 %v2032_v22  ;;  %1319 = vmatprep.mubr.f32.mxu1 %v2280_v12  ;;  %v2036_v13 = vpack.c.bf16 %v1399_v59, %v1387_v52  ;;  %v655_v35 = vsub.f32 %v2644_v28, %v2771_v41  ;;  %v2040_v38 = vpack.c.bf16 %v2614_v1, %v2677_v25  ;;  %v2966_v36 = vand.u32 4294901760, %v2637_v48 }
  0xe5   :  { %635 = vmatmul.mubr.f32.gmra.mrb[2].mxu0 %v2620_v3  ;;  %1987 = vmatprep.subr.bf16.mxu0 %v1986_v8  ;;  %v2034_v29 = vpack.c.bf16 %v1393_v53, %v1381_v20  ;;  %v2038_v8 = vpack.c.bf16 %v2609_v31, %v2684_v60  ;;  %v1994_v0 = vpack.c.bf16 %v2730_v54, %v2701_v49  ;;  %v2967_v63 = vand.u32 4294901760, %v2601_v24 }
  0xe6   :  { %1989 = vmatpush1.bf16.msra.mxu0 %v1988_v57  ;;  %640 = vmatprep.mubr.f32.mxu0 %v2280_v12  ;;  %v656_v53 = vand.u32 4294901760, %v655_v35  ;;  %v2042_v52 = vpack.c.bf16 %v2740_v50, %v2714_v6  ;;  %v1996_v59 = vpack.c.bf16 %v2726_v34, %v2696_v21  ;;  %v2044_v61 = vpack.c.bf16 %v2735_v23, %v2703_v32 }
  0xe7   :  { %1325 = vmatmul.mubr.f32.gmra.mrb[2].mxu1 %v2620_v3  ;;  %2035 = vmatprep.subr.bf16.mxu1 %v2034_v29  ;;  %v1992_v3 = vpack.c.bf16 %v2604_v26, %v2633_v10  ;;  %v2006_v39 = vpack.c.bf16 %v2967_v63, %v2966_v36  ;;  %v2969_v27 = vand.u32 4294901760, %v2609_v31  ;;  %v2971_v24 = vand.u32 4294901760, %v2604_v26 }
  0xe8   :  { %2037 = vmatpush1.bf16.msra.mxu1 %v2036_v13  ;;  %1991 = vmatprep.subr.bf16.mxu0 %v1990_v46  ;;  %v2973_v48 = vand.u32 4294901760, %v2614_v1  ;;  %v2975_v1 = vand.u32 4294901760, %v2696_v21 }
  0xe9   :  { %2039 = vmatprep.subr.bf16.mxu1 %v2038_v8  ;;  %1330 = vmatprep.mubr.f32.mxu1 %v2280_v12 }
  0xea   :  { %646 = vmatmul.mubr.f32.gmra.mrb[4].mxu0 %v645_v14 }
  0xeb   :  { %1336 = vmatmul.mubr.f32.gmra.mrb[4].mxu1 %v645_v14  ;;  %651 = vmatprep.mubr.f32.mxu0 %v2280_v12 }
  0xec   :  { %1341 = vmatprep.mubr.f32.mxu1 %v2280_v12 }
  0xee   :  { %657 = vmatmul.mubr.f32.gmra.mrb[6].mxu0 %v656_v53 }
  0xef   :  { %1347 = vmatmul.mubr.f32.gmra.mrb[6].mxu1 %v656_v53  ;;  %767 = vmatprep.mubr.f32.mxu0 %v2280_v12 }
  0xf0   :  { %1457 = vmatprep.mubr.f32.mxu1 %v2280_v12 }
  0xf2   :  { %769 = vmatmul.mubr.f32.vlgmr.msra.gmra.mrb[0].mxu0 %v2409_v19 }
  0xf3   :  { %1993 = vmatpush1.bf16.msra.mxu0 %v1992_v3  ;;  %1459 = vmatmul.mubr.f32.vlgmr.msra.gmra.mrb[0].mxu1 %v2409_v19 }
  0xf4   :  { %2041 = vmatpush1.bf16.msra.mxu1 %v2040_v38  ;;  %1995 = vmatprep.subr.bf16.mxu0 %v1994_v0 }
  0xf5   :  { %2043 = vmatprep.subr.bf16.mxu1 %v2042_v52  ;;  %774 = vmatprep.mubr.f32.mxu0 %v2280_v12 }
  0xf6   :  { %1464 = vmatprep.mubr.f32.mxu1 %v2280_v12  ;;  %776 = vmatmul.mubr.f32.gmra.mrb[2].mxu0 %v2412_v15 }
  0xf7   :  { %1997 = vmatpush1.bf16.msra.mxu0 %v1996_v59  ;;  %1466 = vmatmul.mubr.f32.gmra.mrb[2].mxu1 %v2412_v15 }
  0xf8   :  { %2045 = vmatpush1.bf16.msra.mxu1 %v2044_v61  ;;  %1999 = vmatprep.subr.bf16.mxu0 %v2635_v9 }
  0xf9   :  { %2047 = vmatprep.subr.bf16.mxu1 %v2682_v51  ;;  %781 = vmatprep.mubr.f32.mxu0 %v2280_v12 }
  0xfa   :  { %1471 = vmatprep.mubr.f32.mxu1 %v2280_v12  ;;  %783 = vmatmul.mubr.f32.gmra.mrb[4].mxu0 %v2597_v37 }
  0xfb   :  { %1473 = vmatmul.mubr.f32.gmra.mrb[4].mxu1 %v2597_v37  ;;  %788 = vmatprep.mubr.f32.mxu0 %v2280_v12 }
  0xfc   :  { %1478 = vmatprep.mubr.f32.mxu1 %v2280_v12 }
  0xfe   :  { %790 = vmatmul.mubr.f32.gmra.mrb[6].mxu0 %v2625_v45 }
  0xff   :  { %1480 = vmatmul.mubr.f32.gmra.mrb[6].mxu1 %v2625_v45  ;;  %876 = vmatprep.mubr.f32.mxu0 %v2280_v12 }
 0x100   :  { %1566 = vmatprep.mubr.f32.mxu1 %v2280_v12 }
 0x102   :  { %879 = vmatmul.mubr.f32.vlgmr.msra.gmra.mrb[0].mxu0 %v2538_v62 }
 0x103   :  { %2001 = vmatpush1.bf16.msra.mxu0 %v2631_v30  ;;  %1569 = vmatmul.mubr.f32.vlgmr.msra.gmra.mrb[0].mxu1 %v2538_v62  ;;  %v2968_v62 = vand.u32 4294901760, %v2684_v60 }
 0x104   :  { %2049 = vmatpush1.bf16.msra.mxu1 %v2675_v5  ;;  %2003 = vmatprep.subr.bf16.mxu0 %v2728_v2 }
 0x105   :  { %2051 = vmatprep.subr.bf16.mxu1 %v2738_v55  ;;  %884 = vmatprep.mubr.f32.mxu0 %v2280_v12  ;;  %v2054_v22 = vpack.c.bf16 %v2969_v27, %v2968_v62 }
 0x106   :  { %1574 = vmatprep.mubr.f32.mxu1 %v2280_v12  ;;  %887 = vmatmul.mubr.f32.gmra.mrb[2].mxu0 %v2548_v40 }
 0x107   :  { %2005 = vmatpush1.bf16.msra.mxu0 %v2724_v42  ;;  %1577 = vmatmul.mubr.f32.gmra.mrb[2].mxu1 %v2548_v40  ;;  %v2970_v40 = vand.u32 4294901760, %v2633_v10  ;;  %v2974_v10 = vand.u32 4294901760, %v2714_v6 }
 0x108   :  { %2053 = vmatpush1.bf16.msra.mxu1 %v2733_v4  ;;  %2007 = vmatprep.subr.bf16.mxu0 %v2006_v39 }
 0x109   :  { %2055 = vmatprep.subr.bf16.mxu1 %v2054_v22  ;;  %892 = vmatprep.mubr.f32.mxu0 %v2280_v12  ;;  %v2008_v31 = vpack.c.bf16 %v2971_v24, %v2970_v40  ;;  %v2058_v26 = vpack.c.bf16 %v1391_v43, %v2974_v10 }
 0x10a   :  { %1582 = vmatprep.mubr.f32.mxu1 %v2280_v12  ;;  %895 = vmatmul.mubr.f32.gmra.mrb[4].mxu0 %v2623_v44 }
 0x10b   :  { %1585 = vmatmul.mubr.f32.gmra.mrb[4].mxu1 %v2623_v44  ;;  %900 = vmatprep.mubr.f32.mxu0 %v2280_v12  ;;  %v2972_v44 = vand.u32 4294901760, %v2677_v25  ;;  %v2976_v25 = vand.u32 4294901760, %v2726_v34 }
 0x10c   :  { %1590 = vmatprep.mubr.f32.mxu1 %v2280_v12 }
 0x10d   :  { %v2056_v60 = vpack.c.bf16 %v2973_v48, %v2972_v44  ;;  %v2012_v49 = vpack.c.bf16 %v2976_v25, %v2975_v1 }
 0x10e   :  { %903 = vmatmul.mubr.f32.gmra.mrb[6].mxu0 %v2644_v28 }
 0x10f   :  { %1593 = vmatmul.mubr.f32.gmra.mrb[6].mxu1 %v2644_v28  ;;  %981 = vmatprep.mubr.f32.mxu0 %v2280_v12  ;;  %v2010_v28 = vpack.c.bf16 %v701_v16, %v689_v7  ;;  %v2978_v7 = vand.u32 4294901760, %v2735_v23 }
 0x110   :  { %1671 = vmatprep.mubr.f32.mxu1 %v2280_v12 }
 0x112   :  { %985 = vmatmul.mubr.f32.vlgmr.msra.gmra.mrb[0].mxu0 %v2568_v18 }
 0x113   :  { %2009 = vmatpush1.bf16.msra.mxu0 %v2008_v31  ;;  %1675 = vmatmul.mubr.f32.vlgmr.msra.gmra.mrb[0].mxu1 %v2568_v18  ;;  %v2977_v18 = vand.u32 4294901760, %v2703_v32 }
 0x114   :  { %2057 = vmatpush1.bf16.msra.mxu1 %v2056_v60  ;;  %2011 = vmatprep.subr.bf16.mxu0 %v2010_v28 }
 0x115   :  { %2059 = vmatprep.subr.bf16.mxu1 %v2058_v26  ;;  %990 = vmatprep.mubr.f32.mxu0 %v2280_v12  ;;  %v2060_v6 = vpack.c.bf16 %v2978_v7, %v2977_v18 }
 0x116   :  { %1680 = vmatprep.mubr.f32.mxu1 %v2280_v12  ;;  %994 = vmatmul.mubr.f32.gmra.mrb[2].mxu0 %v2571_v17 }
 0x117   :  { %2013 = vmatpush1.bf16.msra.mxu0 %v2012_v49  ;;  %1684 = vmatmul.mubr.f32.gmra.mrb[2].mxu1 %v2571_v17 }
 0x118   :  { %2061 = vmatpush1.bf16.msra.mxu1 %v2060_v6  ;;  %2015 = vmatprep.subr.bf16.mxu0 %v2635_v9 }
 0x119   :  { %2063 = vmatprep.subr.bf16.mxu1 %v2682_v51  ;;  %999 = vmatprep.mubr.f32.mxu0 %v2280_v12 }
 0x11a   :  { %1689 = vmatprep.mubr.f32.mxu1 %v2280_v12  ;;  %1003 = vmatmul.mubr.f32.gmra.mrb[4].mxu0 %v2641_v33 }
 0x11b   :  { %1693 = vmatmul.mubr.f32.gmra.mrb[4].mxu1 %v2641_v33  ;;  %1008 = vmatprep.mubr.f32.mxu0 %v2280_v12 }
 0x11c   :  { %1698 = vmatprep.mubr.f32.mxu1 %v2280_v12 }
 0x11e   :  { %1012 = vmatmul.mubr.f32.gmra.mrb[6].mxu0 %v2771_v41 }
 0x11f   :  { %1702 = vmatmul.mubr.f32.gmra.mrb[6].mxu1 %v2771_v41  ;;  %1106 = vmatprep.mubr.f32.mxu0 %v2280_v12 }
 0x120   :  { %1796 = vmatprep.mubr.f32.mxu1 %v2280_v12 }
 0x122   :  { %1108 = vmatmul.mubr.f32.vlgmr.msra.gmra.mrb[0].mxu0 %v2409_v19 }
 0x123   :  { %2017 = vmatpush1.bf16.msra.mxu0 %v2631_v30  ;;  %1798 = vmatmul.mubr.f32.vlgmr.msra.gmra.mrb[0].mxu1 %v2409_v19 }
 0x124   :  { %2065 = vmatpush1.bf16.msra.mxu1 %v2675_v5  ;;  %2019 = vmatprep.subr.bf16.mxu0 %v2728_v2 }
 0x125   :  { %2067 = vmatprep.subr.bf16.mxu1 %v2738_v55  ;;  %1113 = vmatprep.mubr.f32.mxu0 %v2280_v12 }
 0x126   :  { %1803 = vmatprep.mubr.f32.mxu1 %v2280_v12  ;;  %1115 = vmatmul.mubr.f32.gmra.mrb[2].mxu0 %v2412_v15 }
 0x127   :  { %2021 = vmatpush1.bf16.msra.mxu0 %v2724_v42  ;;  %1805 = vmatmul.mubr.f32.gmra.mrb[2].mxu1 %v2412_v15 }
 0x128   :  { %2069 = vmatpush1.bf16.msra.mxu1 %v2733_v4  ;;  %1120 = vmatprep.mubr.f32.mxu0 %v2280_v12 }
 0x129   :  { %1810 = vmatprep.mubr.f32.mxu1 %v2280_v12 }
 0x12a   :  { %1122 = vmatmul.mubr.f32.gmra.mrb[4].mxu0 %v2597_v37 }
 0x12b   :  { %1812 = vmatmul.mubr.f32.gmra.mrb[4].mxu1 %v2597_v37  ;;  %1127 = vmatprep.mubr.f32.mxu0 %v2280_v12 }
 0x12c   :  { %1817 = vmatprep.mubr.f32.mxu1 %v2280_v12 }
 0x12e   :  { %1129 = vmatmul.mubr.f32.gmra.mrb[6].mxu0 %v2625_v45 }
 0x12f   :  { %1819 = vmatmul.mubr.f32.gmra.mrb[6].mxu1 %v2625_v45  ;;  %1207 = vmatprep.mubr.f32.mxu0 %v2280_v12 }
 0x130   :  { %1897 = vmatprep.mubr.f32.mxu1 %v2280_v12 }
 0x132   :  { %1209 = vmatmul.mubr.f32.vlgmr.msra.gmra.mrb[0].mxu0 %v2409_v19 }
 0x133   :  { %1899 = vmatmul.mubr.f32.vlgmr.msra.gmra.mrb[0].mxu1 %v2409_v19  ;;  %1214 = vmatprep.mubr.f32.mxu0 %v2280_v12  ;;  %v516_v19 = vpop.permute.xlu0 %515 }
 0x134   :  { %1904 = vmatprep.mubr.f32.mxu1 %v2280_v12 }
 0x136   :  { %1216 = vmatmul.mubr.f32.gmra.mrb[2].mxu0 %v2412_v15 }
 0x137   :  { %1906 = vmatmul.mubr.f32.gmra.mrb[2].mxu1 %v2412_v15  ;;  %1221 = vmatprep.mubr.f32.mxu0 %v2280_v12  ;;  %v531_v11 = vpop.permute.xlu0 %530 }
 0x138   :  { %1911 = vmatprep.mubr.f32.mxu1 %v2280_v12 }
 0x13a   :  { %1223 = vmatmul.mubr.f32.gmra.mrb[4].mxu0 %v2597_v37 }
 0x13b   :  { %1913 = vmatmul.mubr.f32.gmra.mrb[4].mxu1 %v2597_v37  ;;  %1228 = vmatprep.mubr.f32.mxu0 %v2280_v12 }
 0x13c   :  { %1918 = vmatprep.mubr.f32.mxu1 %v2280_v12 }
 0x13e   :  { %1230 = vmatmul.mubr.f32.gmra.mrb[6].mxu0 %v2625_v45  ;;  %v521_v4 = vpop.permute.xlu1 %520 }
 0x13f   :  { %1920 = vmatmul.mubr.f32.gmra.mrb[6].mxu1 %v2625_v45 }
 0x142   :  { %v526_v54 = vpop.permute.xlu1 %525 }
 0x205   :  { %v1210_v17 = vpop.f32.mrb[0].mxu0 }
 0x206   :  { %v2070_v15 = vadd.f32 %v1210_v17, %v516_v19  ;;  %v1900_v30 = vpop.f32.mrb[0].mxu1  ;;  %v1212_v9 = vpop.f32.mrb[1].mxu0 }
 0x207   :  { %v2078_v33 = vadd.f32 %v1900_v30, %v516_v19  ;;  %v2071_v5 = vadd.f32 %v1212_v9, %v516_v19  ;;  %v1902_v51 = vpop.f32.mrb[1].mxu1 }
 0x208   :  { %1926 = vst [vmem:[#allocation2] sm:$0xff] %v2070_v15  ;;  %v2079_v21 = vadd.f32 %v1902_v51, %v516_v19 }
 0x209   :  { %1928 = vst [vmem:[#allocation2 + $0x10] sm:$0xff] %v2078_v33  ;;  %1927 = vst [vmem:[#allocation2 + $0x8] sm:$0xff] %v2071_v5  ;;  %v1217_v37 = vpop.f32.mrb[2].mxu0 }
 0x20a   :  { %1929 = vst [vmem:[#allocation2 + $0x18] sm:$0xff] %v2079_v21  ;;  %v1907_v12 = vpop.f32.mrb[2].mxu1  ;;  %v2072_v32 = vadd.f32 %v1217_v37, %v521_v4  ;;  %v1219_v42 = vpop.f32.mrb[3].mxu0 }
 0x20b   :  { %v2080_v34 = vadd.f32 %v1907_v12, %v521_v4  ;;  %v2073_v45 = vadd.f32 %v1219_v42, %v521_v4  ;;  %v1909_v2 = vpop.f32.mrb[3].mxu1 }
 0x20c   :  { %1930 = vst [vmem:[#allocation2 + $0x20] sm:$0xff] %v2072_v32  ;;  %v2081_v23 = vadd.f32 %v1909_v2, %v521_v4 }
 0x20d   :  { %1932 = vst [vmem:[#allocation2 + $0x30] sm:$0xff] %v2080_v34  ;;  %1931 = vst [vmem:[#allocation2 + $0x28] sm:$0xff] %v2073_v45  ;;  %v1224_v55 = vpop.f32.mrb[4].mxu0 }
 0x20e   :  { %1933 = vst [vmem:[#allocation2 + $0x38] sm:$0xff] %v2081_v23  ;;  %v1914_v50 = vpop.f32.mrb[4].mxu1  ;;  %v2074_v16 = vadd.f32 %v1224_v55, %v526_v54  ;;  %v1226_v43 = vpop.f32.mrb[5].mxu0 }
 0x20f   :  { %v2082_v41 = vadd.f32 %v1914_v50, %v526_v54  ;;  %v2075_v56 = vadd.f32 %v1226_v43, %v526_v54  ;;  %v1916_v58 = vpop.f32.mrb[5].mxu1 }
 0x210   :  { %1934 = vst [vmem:[#allocation2 + $0x40] sm:$0xff] %v2074_v16  ;;  %v2083_v47 = vadd.f32 %v1916_v58, %v526_v54 }
 0x211   :  { %1936 = vst [vmem:[#allocation2 + $0x50] sm:$0xff] %v2082_v41  ;;  %1935 = vst [vmem:[#allocation2 + $0x48] sm:$0xff] %v2075_v56  ;;  %v1231_v20 = vpop.f32.mrb[6].mxu0 }
 0x212   :  { %1937 = vst [vmem:[#allocation2 + $0x58] sm:$0xff] %v2083_v47  ;;  %v2076_v57 = vadd.f32 %v1231_v20, %v531_v11  ;;  %v1921_v13 = vpop.f32.mrb[6].mxu1  ;;  %v1233_v29 = vpop.f32.mrb[7].mxu0 }
 0x213   :  { %v2084_v46 = vadd.f32 %v1921_v13, %v531_v11  ;;  %v2077_v14 = vadd.f32 %v1233_v29, %v531_v11  ;;  %v1923_v35 = vpop.f32.mrb[7].mxu1 }
 0x214   :  { %1938 = vst [vmem:[#allocation2 + $0x60] sm:$0xff] %v2076_v57  ;;  %v2085_v8 = vadd.f32 %v1923_v35, %v531_v11 }
 0x215   :  { %1940 = vst [vmem:[#allocation2 + $0x70] sm:$0xff] %v2084_v46  ;;  %1939 = vst [vmem:[#allocation2 + $0x68] sm:$0xff] %v2077_v14 }
 0x216   :  { %1941 = vst [vmem:[#allocation2 + $0x78] sm:$0xff] %v2085_v8 }
 0x217   :  { %2263 = shalt.err (!%p2260_p4)
}
 0x218   :  { %s2264_s29 = scalar_lea.hbm %s2952_s5, 2048 }
 0x219   :  { %p2265_p5 = scmp.ne.s32.totalorder %s2952_s5, %s2264_s29  ;;  %p2268_p6 = scmp.lt.u32.totalorder %s2264_s29, %s2952_s5 }
 0x21b   :  { %p2270_p7 = pnand %p2268_p6, %p2265_p5 }
 0x21d   :  { %2273 = shalt.err (!%p2270_p7)
}
 0x21e   :  { %s2282_s1 = smov 512   ;;  %s2283_s2 = smov 32  }
 0x21f   :  { %1953 = dma.vmem_to_hbm [thread:$0]  %s1948_s4, 2048, %s2952_s5, [#allocation3], %s2282_s1, %s2282_s1, %s2283_s2  }
 0x220   :  { %2274 = dma.done.wait [#allocation3], 2048  }
 0x221   :  { %2275 = vsyncadd [#allocation3], 4294965248 }
 0x222   :  { %1957 = vsyncpa [#allocation3], 1 }

</bundles_post_ra>
